<compile_context>
chip_gen: v7x
topology: tpu7x:2x2x1
jax: 0.10.0
libtpu: 0.0.40
codegen_flags: <defaults>
</compile_context>

<pallas_src>
import jax
import jax.numpy as jnp
from jax.experimental import pallas as pl
from jax.experimental.pallas import tpu as pltpu


def gating_kernel(x_ref, w_ref, b_ref, o_ref):
    # x_ref: (tb, D) f32      -- streamed with the grid index
    # w_ref: (D, E_cmp) bf16  -- pinned, zero-padded expert columns
    # b_ref: (1, E_cmp) f32   -- pinned, padded columns = -1e30
    # o_ref: (tb, E)   f32    -- exactly num_experts wide (no lane pad in HBM)
    E = o_ref.shape[-1]
    x_bf = x_ref[...].astype(jnp.bfloat16)          # cast on VPU, free under DMA
    logits = jnp.dot(x_bf, w_ref[...],
                     preferred_element_type=jnp.float32) + b_ref[...]
    # Numerically-stable softmax along experts (last / lane axis).  Padded
    # columns carry bias -1e30 -> exp(...) == 0 exactly, so they perturb
    # neither the max nor the denominator.
    m = jnp.max(logits, axis=-1, keepdims=True)
    e = jnp.exp(logits - m)
    denom = jnp.sum(e, axis=-1, keepdims=True)
    o_ref[...] = (e[:, :E] / denom).astype(o_ref.dtype)   # exact normalization


def _choose_tb(B, D, E, E_cmp, budget_bytes=24 * 1024 * 1024):
    """Largest batch tile (multiple of 16, <= 8192) whose VMEM footprint —
    double-buffered f32 x and f32 out streams plus the single-buffered pinned
    w/b — stays under `budget_bytes` (headroom on v7x's 64 MiB VMEM)."""
    fixed = D * E_cmp * 2 + E_cmp * 4        # pinned bf16 w + f32 b (Buffered(1))
    per_row = 2 * 4 * (D + E)                # 2 buffers x (f32 x row + f32 out row)
    tb = (budget_bytes - fixed) // max(per_row, 1)
    tb = max(16, min(8192, (tb // 16) * 16))
    b8 = ((B + 7) // 8) * 8
    if b8 >= 32:
        # Keep at least 2 grid tiles so v7x's two TensorCores both get work.
        half = -(-(b8 // 2) // 16) * 16
        tb = min(tb, half)
    return min(tb, b8)


def gating_network(x, w, b, *, tb=None):
    """x: (B, D) f32, w: (D, E) f32, b: (E,) f32 -> (B, E) f32 softmax gates."""
    B, D = x.shape
    E = w.shape[1]
    E_cmp = pl.cdiv(E, 128) * 128            # lane-dense compute width in-kernel
    if tb is None:
        tb = _choose_tb(B, D, E, E_cmp)
    n_tiles = pl.cdiv(B, tb)
    B_pad = n_tiles * tb

    # Pinned parameters (tiny, one-off copies — unlike the x stream which
    # stays f32 in HBM): bf16 weights with zero-padded expert columns, f32
    # bias with -1e30 in the padded columns.
    w_b = w.astype(jnp.bfloat16)
    if E_cmp != E:
        w_b = jnp.zeros((D, E_cmp), jnp.bfloat16).at[:, :E].set(w_b)
    b_p = jnp.full((1, E_cmp), -1e30, jnp.float32).at[0, :E].set(
        b.astype(jnp.float32))

    # Batch padding (zero rows) only when B is not a multiple of the tile.
    x_in = x if B_pad == B else jnp.pad(x, ((0, B_pad - B), (0, 0)))

    out = pl.pallas_call(
        gating_kernel,
        out_shape=jax.ShapeDtypeStruct((B_pad, E), jnp.float32),
        grid_spec=pltpu.PrefetchScalarGridSpec(
            num_scalar_prefetch=0,
            grid=(n_tiles,),
            in_specs=[
                pl.BlockSpec((tb, D), lambda i: (i, 0)),        # x: streams with i
                pl.BlockSpec((D, E_cmp), lambda i: (0, 0),      # w: pinned
                             pipeline_mode=pl.Buffered(1)),
                pl.BlockSpec((1, E_cmp), lambda i: (0, 0),      # b: pinned
                             pipeline_mode=pl.Buffered(1)),
            ],
            out_specs=pl.BlockSpec((tb, E), lambda i: (i, 0)),
        ),
        compiler_params=pltpu.CompilerParams(
            dimension_semantics=("parallel",),        # megacore sharding on v7x
            vmem_limit_bytes=32 * 1024 * 1024,        # >= ~24 MiB tile budget; can
                                                      # be raised on v6e's 128 MiB
        ),
    )(x_in, w_b, b_p)

    return out if B_pad == B else out[:B]


def init_params(key, input_size, num_experts):
    # Deterministic init mimicking nn.Linear defaults: U(-1/sqrt(D), 1/sqrt(D))
    kw, kb = jax.random.split(key)
    bound = 1.0 / (input_size ** 0.5)
    w = jax.random.uniform(kw, (input_size, num_experts), jnp.float32,
                           minval=-bound, maxval=bound)
    b = jax.random.uniform(kb, (num_experts,), jnp.float32,
                           minval=-bound, maxval=bound)
    return w, b


if __name__ == "__main__":
    key = jax.random.PRNGKey(0)
    k_x, k_p = jax.random.split(key)

    batch = 8
    input_size = 32     # stands in for X_train.shape[2]
    num_experts = 3

    x = jax.random.normal(k_x, (batch, input_size), jnp.float32)
    w, b = init_params(k_p, input_size, num_experts)

    out = jax.block_until_ready(gating_network(x, w, b))

    # Reference using the same bf16-input / f32-accumulation matmul contract.
    ref = jax.nn.softmax(
        jnp.dot(x.astype(jnp.bfloat16), w.astype(jnp.bfloat16),
                preferred_element_type=jnp.float32) + b, axis=1)

    assert out.shape == (batch, num_experts)
    assert jnp.allclose(out, ref, atol=5e-3), "mismatch vs reference"
    assert jnp.allclose(jnp.sum(out, axis=1), 1.0, atol=1e-5)

    print("KERNEL_OK")
</pallas_src>

<mosaic_0001>
module attributes {stable_mosaic.version = 11 : i64} {
  func.func @gating_kernel(%arg0: i32, %arg1: memref<8x32xf32, #tpu.memory_space<vmem>>, %arg2: memref<32x128xbf16, #tpu.memory_space<vmem>>, %arg3: memref<1x128xf32, #tpu.memory_space<vmem>>, %arg4: memref<8x3xf32, #tpu.memory_space<vmem>>) attributes {dimension_semantics = [#tpu.dimension_semantics<parallel>], iteration_bounds = array<i64: 1>, scalar_prefetch = 0 : i64, scratch_operands = 0 : i64, tpu.core_type = #tpu.core_type<tc>, window_params = [{transform_indices = @transform_0, window_bounds = array<i64: 8, 32>}, {pipeline_mode = #tpu.pipeline_mode<synchronous>, transform_indices = @transform_1, window_bounds = array<i64: 32, 128>}, {pipeline_mode = #tpu.pipeline_mode<synchronous>, transform_indices = @transform_2, window_bounds = array<i64: 1, 128>}, {transform_indices = @transform_3, window_bounds = array<i64: 8, 3>}]} {
    %c0 = arith.constant 0 : index
    %c0_0 = arith.constant 0 : index
    %0 = vector.load %arg1[%c0, %c0_0] : memref<8x32xf32, #tpu.memory_space<vmem>>, vector<8x32xf32>
    %1 = arith.truncf %0 : vector<8x32xf32> to vector<8x32xbf16>
    %c0_1 = arith.constant 0 : index
    %c0_2 = arith.constant 0 : index
    %2 = vector.load %arg2[%c0_1, %c0_2] : memref<32x128xbf16, #tpu.memory_space<vmem>>, vector<32x128xbf16>
    %cst = arith.constant dense<0.000000e+00> : vector<8x128xf32>
    %3 = tpu.matmul %1, %2, %cst {dimension_numbers = #tpu.dot_dimension_numbers<[1], [0], [0], [1], [0, 0, 1, 1], [], []>} : vector<8x32xbf16>, vector<32x128xbf16>, vector<8x128xf32> -> vector<8x128xf32>
    %c0_3 = arith.constant 0 : index
    %c0_4 = arith.constant 0 : index
    %4 = vector.load %arg3[%c0_3, %c0_4] : memref<1x128xf32, #tpu.memory_space<vmem>>, vector<1x128xf32>
    %5 = vector.broadcast %4 : vector<1x128xf32> to vector<8x128xf32>
    %6 = arith.addf %3, %5 : vector<8x128xf32>
    %cst_5 = arith.constant dense<0xFF800000> : vector<8xf32>
    %7 = vector.multi_reduction <maximumf>, %6, %cst_5 [1] : vector<8x128xf32> to vector<8xf32>
    %8 = vector.shape_cast %7 : vector<8xf32> to vector<8x1xf32>
    %9 = vector.broadcast %8 : vector<8x1xf32> to vector<8x128xf32>
    %10 = arith.subf %6, %9 : vector<8x128xf32>
    %11 = math.exp %10 : vector<8x128xf32>
    %cst_6 = arith.constant dense<0.000000e+00> : vector<8xf32>
    %12 = vector.multi_reduction <add>, %11, %cst_6 [1] : vector<8x128xf32> to vector<8xf32>
    %13 = vector.shape_cast %12 : vector<8xf32> to vector<8x1xf32>
    %14 = vector.extract_strided_slice %11 {offsets = [0, 0], sizes = [8, 3], strides = [1, 1]} : vector<8x128xf32> to vector<8x3xf32>
    %15 = vector.broadcast %13 : vector<8x1xf32> to vector<8x3xf32>
    %16 = arith.divf %14, %15 : vector<8x3xf32>
    %c0_7 = arith.constant 0 : index
    %c0_8 = arith.constant 0 : index
    %17 = vector.load %arg4[%c0_7, %c0_8] : memref<8x3xf32, #tpu.memory_space<vmem>>, vector<8x3xf32>
    tpu.vector_store %arg4[%c0_7, %c0_8], %16 {strides = array<i32>} : memref<8x3xf32, #tpu.memory_space<vmem>>, vector<8x3xf32>,
    return
  }
  func.func @transform_0(%arg0: i32) -> (i32, i32) {
    %c0_i32 = arith.constant 0 : i32
    %c0_i32_0 = arith.constant 0 : i32
    return %arg0, %c0_i32 : i32, i32
  }
  func.func @transform_1(%arg0: i32) -> (i32, i32) {
    %c0_i32 = arith.constant 0 : i32
    %c0_i32_0 = arith.constant 0 : i32
    %c0_i32_1 = arith.constant 0 : i32
    return %c0_i32, %c0_i32_0 : i32, i32
  }
  func.func @transform_2(%arg0: i32) -> (i32, i32) {
    %c0_i32 = arith.constant 0 : i32
    %c0_i32_0 = arith.constant 0 : i32
    %c0_i32_1 = arith.constant 0 : i32
    return %c0_i32, %c0_i32_0 : i32, i32
  }
  func.func @transform_3(%arg0: i32) -> (i32, i32) {
    %c0_i32 = arith.constant 0 : i32
    %c0_i32_0 = arith.constant 0 : i32
    return %arg0, %c0_i32 : i32, i32
  }
}

</mosaic_0001>

<bundles_post_ra>
// kernel: tpu_custom_call.1
= control target key start
LH: loop header
LB: loop body
LE: loop exit
PB: predicated region body
PF: predicated region fallthrough
CT: control target
= control target key end

     0   :  { %8 = vsyncpa [#allocation3], 0  ;;  %s265_s0 = inlined_call_operand.hbm [shape: f32[8,32], index: 0, kind: input, shape index: {}]   ;;  %s266_s1 = inlined_call_operand.hbm [shape: bf16[32,128], index: 1, kind: input, shape index: {}]   ;;  %s267_s2 = inlined_call_operand.vmem [shape: f32[1,128], index: 2, kind: input, shape index: {}]   ;;  %s268_s3 = inlined_call_operand.vmem [shape: f32[8,3], index: 3, kind: output, shape index: {}]  }
   0x1   :  { %9 = vsyncpa [#allocation5], 0  ;;  %s202_s12 = smov [#allocation2]   ;;  %s203_s14 = smov [#allocation4]  }
   0x2   :  { %s16_s13 = sshll.u32 %s202_s12, 4  ;;  %s25_s15 = sshll.u32 %s203_s14, 4  ;;  %s17_s13 = int_to_ptr.vmem [resolvable:$true] %s16_s13  ;;  %s228_s15 = int_to_ptr.vmem [resolvable:$true] %s25_s15 }
   0x3   :  { %s154_s18 = scalar_lea.hbm %s265_s0, 128 }
   0x4   :  { %p155_p0 = scmp.ne.s32.totalorder %s265_s0, %s154_s18  ;;  %p158_p1 = scmp.lt.u32.totalorder %s154_s18, %s265_s0 }
   0x6   :  { %p160_p2 = pnand %p158_p1, %p155_p0 }
   0x8   :  { %163 = shalt.err (!%p160_p2)
}
   0x9   :  { %s164_s23 = scalar_lea.vmem %s17_s13, 128  ;;  %p169_p4 = scmp.lt.s32.totalorder %s17_s13, %s17_s13 }
   0xa   :  { %p165_p3 = scmp.ne.s32.totalorder %s17_s13, %s164_s23  ;;  %p170_p5 = scmp.lt.s32.totalorder %s164_s23, %s164_s23 }
   0xc   :  { %p171_p6 = por %p170_p5, %p169_p4 }
   0xe   :  { %p172_p7 = pnand %p171_p6, %p165_p3 }
  0x10   :  { %175 = shalt.err (!%p172_p7)
}
  0x11   :  { %19 = dma.hbm_to_vmem [thread:$0]  %s265_s0, 128, %s17_s13, [#allocation3]  }
  0x12   :  { %s176_s28 = scalar_lea.hbm %s266_s1, 256 }
  0x13   :  { %p177_p8 = scmp.ne.s32.totalorder %s266_s1, %s176_s28  ;;  %p180_p9 = scmp.lt.u32.totalorder %s176_s28, %s266_s1 }
  0x15   :  { %p182_p10 = pnand %p180_p9, %p177_p8 }
  0x17   :  { %185 = shalt.err (!%p182_p10)
}
  0x18   :  { %s186_s6 = scalar_lea.vmem %s228_s15, 256  ;;  %p191_p12 = scmp.lt.s32.totalorder %s228_s15, %s228_s15 }
  0x19   :  { %p187_p11 = scmp.ne.s32.totalorder %s228_s15, %s186_s6  ;;  %p192_p13 = scmp.lt.s32.totalorder %s186_s6, %s186_s6 }
  0x1b   :  { %p193_p0 = por %p192_p13, %p191_p12 }
  0x1d   :  { %p194_p1 = pnand %p193_p0, %p187_p11 }
  0x1f   :  { %197 = shalt.err (!%p194_p1)
}
  0x20   :  { %s204_s0 = smov 64   ;;  %s205_s7 = smov 4  }
  0x21   :  { %31 = dma.hbm_to_vmem [thread:$0]  %s266_s1, 256, %s228_s15, [#allocation5], %s204_s0, %s204_s0, %s205_s7  }
  0x22   :  { %198 = dma.done.wait [#allocation3], 128  }
  0x23   :  { %199 = vsyncadd [#allocation3], 4294967168 }
  0x24   :  { %200 = dma.done.wait [#allocation5], 256  }
  0x25   :  { %201 = vsyncadd [#allocation5], 4294967040  ;;  %v206_v0 = vmov 0.0   ;;  %vm207_vm0 = vmmov 0   ;;  %v148_v1 = vld [vmem:[#allocation4] sm:$0xff]   ;;  %v149_v2 = vld [vmem:[#allocation4 + $0x8] sm:$0xff]  }
  0x26   :  { %134 = vmatprep.subr.bf16.mxu0 %v206_v0  ;;  %138 = vmatprep.mubr.msk.bf16.mxu0 %vm207_vm0, %v206_v0  ;;  %v41_v3 = vld [vmem:[#allocation2] sm:$0xff]  ;;  %vm66_vm1 = vcmask 261120   ;;  %v127_v5 = vld [vmem:[%s267_s2] ss:$0 sm:$0xff]  ;;  %vm119_vm2 = vcmask 23552  }
  0x27   :  { %135 = vmatpush3.bf16.msra.mxu0 %v148_v1  ;;  %v42_v4 = vpack.c.bf16 %v41_v3, %v41_v3 }
  0x28   :  { %136 = vmatprep.subr.bf16.mxu0 %v206_v0 }
  0x2b   :  { %137 = vmatpush3.bf16.msra.mxu0 %v149_v2 }
  0x2e   :  { %139 = vmatmul.mubr.msk.bf16.vlgmr.msra.gmra.mrb[0].mxu0 %vm66_vm1, %v42_v4 }
 0x101   :  { %v104_v6 = vpop.f32.mrb[0].mxu0 }
 0x102   :  { %v105_v7 = vadd.f32 %v127_v5, %v104_v6  ;;  %v140_v8 = vpop.f32.mrb[1].mxu0 }
 0x103   :  { %v107_v9 = vpop.f32.mrb[2].mxu0 }
 0x104   :  { %110 = vmax.xlane.f32.xlu0 %v105_v7  ;;  %v141_v10 = vpop.f32.mrb[3].mxu0 }
 0x191   :  { %v111_v11 = vpop.xlane.xlu0 %110 }
 0x192   :  { %v112_v12 = vsub.f32 %v105_v7, %v111_v11 }
 0x194   :  { %v113_v13 = vmul.f32 1.442695, %v112_v12 }
 0x196   :  { %150 = vpow2.f32 %v113_v13 }
 0x1a0   :  { %v151_v14 = vpop.eup %150 }
 0x1a1   :  { %115 = vadd.xlane.f32.xlu0 %v151_v14 }
 0x22e   :  { %v116_v15 = vpop.xlane.xlu0 %115 }
 0x22f   :  { %152 = vrcp.f32 %v116_v15 }
 0x239   :  { %v153_v16 = vpop.eup %152 }
 0x23a   :  { %v118_v17 = vmul.f32 %v153_v16, %v151_v14 }
 0x23c   :  { %120 = vst.msk [vmem:[%s268_s3] sm:$0xff] %vm119_vm2, %v118_v17 }
 0x23d   :  { %125 = vsyncpa [#allocation3], 1 }
 0x23e   :  { %126 = vsyncpa [#allocation5], 1 }

</bundles_post_ra>
